<compile_context>
chip_gen: v6e
topology: v6e:2x2x1
jax: 0.10.0
libtpu: 0.0.40
codegen_flags: <defaults>
</compile_context>

<pallas_src>
import jax
import jax.numpy as jnp
import numpy as np
from jax.experimental import pallas as pl
from jax.experimental.pallas import tpu as pltpu


def _round_up(n, m):
    return ((n + m - 1) // m) * m


def _pad2(a, rows, cols):
    r, c = a.shape
    return jnp.pad(a, ((0, rows - r), (0, cols - c)))


# ----------------------------------------------------------------------------
# Kernel 1: step-invariant encoder projection  xProj = x @ wx + (bx + bs)
# (sEmbed bias folded in too — only the sum xProj + sProj is ever used)
# ----------------------------------------------------------------------------
def xproj_kernel(x_ref, wx_ref, bxs_ref, xproj_ref):
    B, T, xDp = x_ref.shape
    aDp = wx_ref.shape[1]
    x2 = x_ref[...].reshape(B * T, xDp)                               # bf16
    xp = jnp.dot(x2, wx_ref[...], preferred_element_type=jnp.float32) + bxs_ref[...]
    xproj_ref[...] = xp.reshape(B, T, aDp)                            # f32


# ----------------------------------------------------------------------------
# Kernel 2: one full decoder step (attention + context + GRU + output FC)
# ----------------------------------------------------------------------------
def decoder_step_kernel(
    xproj_ref,   # (B, T, aDp)   f32   precomputed x@wx + bx + bs
    x_ref,       # (B, T, xDp)   bf16  encoder features (for context)
    s_ref,       # (B, sDp)      f32   previous GRU hidden state
    giy_ref,     # (B, 3*sDp)    f32   (emb @ W_ih_y + b_ih)[yPrev]  (token path, pre-gathered)
    ws_ref,      # (sDp, aDp)    bf16  sEmbed.weight^T (bias folded into xproj)
    ww_ref,      # (1, aDp)      f32   wEmbed.weight row (bias dropped)
    wih_x_ref,   # (xDp, 3*sDp)  bf16  GRU W_ih rows for context (gates at lane 0/sDp/2*sDp)
    whh_ref,     # (sDp, 3*sDp)  bf16  GRU W_hh^T
    bhh_ref,     # (1, 3*sDp)    f32
    wfc_ref,     # (sDp, yDp)    bf16  fc.weight^T * temperature
    bfc_ref,     # (1, yDp)      f32   fc.bias * temperature
    out_ref,     # (B, yDp)      f32
    state_ref,   # (B, sDp)      f32
    alpha_ref,   # (B, T)        f32
):
    f32 = jnp.float32
    bf16 = jnp.bfloat16

    s = s_ref[...]                                    # (B, sDp) f32, pad lanes are 0
    s_bf = s.astype(bf16)
    B, T, aDp = xproj_ref.shape
    sDp = s.shape[1]

    # ---------------- AttentionUnit (xProj + both biases hoisted) ------------
    sProj = jnp.dot(s_bf, ws_ref[...], preferred_element_type=f32)
    sumTanh = jnp.tanh(xproj_ref[...] + sProj[:, None, :])            # (B, T, aDp) f32
    # wEmbed as VPU multiply + lane reduce (N=1 matmul avoided; scalar bias
    # dropped — softmax over T is shift-invariant so it is a no-op).
    v = jnp.sum(sumTanh * ww_ref[...].reshape(1, 1, aDp), axis=-1)    # (B, T)

    m = jnp.max(v, axis=1, keepdims=True)
    e = jnp.exp(v - m)
    alpha = e / jnp.sum(e, axis=1, keepdims=True)                     # (B, T) f32
    # NOTE: alpha has T < 128 lanes -> one tiny masked store; negligible here.
    alpha_ref[...] = alpha

    # context = bmm(alpha.unsqueeze(1), x).squeeze(1) on the MXU
    ctx = jnp.einsum("bqt,btd->bqd",
                     alpha[:, None, :].astype(bf16), x_ref[...],
                     preferred_element_type=f32)[:, 0, :]             # (B, xDp) f32

    # ---------------- GRU single step ----------------------------------------
    # Token-path contribution (yemb @ W_ih_y + b_ih) is pre-gathered into
    # giy_ref; only the context matmul remains.  Gates sit at 128-aligned lane
    # offsets so the slices below are free.
    gi = giy_ref[...] + jnp.dot(ctx.astype(bf16), wih_x_ref[...],
                                preferred_element_type=f32)           # (B, 3*sDp)
    gh = jnp.dot(s_bf, whh_ref[...], preferred_element_type=f32) + bhh_ref[...]

    i_r, i_z, i_n = gi[:, :sDp], gi[:, sDp:2 * sDp], gi[:, 2 * sDp:]
    h_r, h_z, h_n = gh[:, :sDp], gh[:, sDp:2 * sDp], gh[:, 2 * sDp:]

    r = jax.nn.sigmoid(i_r + h_r)
    z = jax.nn.sigmoid(i_z + h_z)
    n = jnp.tanh(i_n + r * h_n)
    h_new = (1.0 - z) * n + z * s                                     # (B, sDp); pad lanes stay 0
    state_ref[...] = h_new                                            # lane-dense store

    # ---------------- output FC (temperature pre-folded, yD padded) ----------
    out_ref[...] = jnp.dot(h_new.astype(bf16), wfc_ref[...],
                           preferred_element_type=f32) + bfc_ref[...]


# ----------------------------------------------------------------------------
# One-time parameter preparation (pad to 128, fuse token path, cast to bf16)
# ----------------------------------------------------------------------------
def prepare_tpu_params(p):
    sD, aD = p["ws_t"].shape
    xD = p["wx_t"].shape[0]
    yD = p["wfc_t"].shape[1]
    sDp, aDp, xDp, yDp = (_round_up(d, 128) for d in (sD, aD, xD, yD))
    bf16 = jnp.bfloat16

    def pad_gates(w, in_pad):
        # (in_dim, 3*sD) -> (in_pad, 3*sDp); gate g lands at lane offset g*sDp.
        in_dim = w.shape[0]
        out = jnp.zeros((in_pad, 3 * sDp), jnp.float32)
        for g in range(3):
            out = out.at[:in_dim, g * sDp:g * sDp + sD].set(w[:, g * sD:(g + 1) * sD])
        return out

    def pad_gate_bias(b):
        out = jnp.zeros((1, 3 * sDp), jnp.float32)
        for g in range(3):
            out = out.at[:, g * sDp:g * sDp + sD].set(b[:, g * sD:(g + 1) * sD])
        return out

    wih_y = p["wih_t"][:aD]   # rows multiplying yemb (cat order [yProj, context])
    wih_x = p["wih_t"][aD:]   # rows multiplying context

    # Fuse embedding lookup + GRU token-path projection + b_ih into one gather
    # table; gather-then-matmul == matmul-then-gather row-wise (exact).
    emb_p = _pad2(p["tgt_embedding"], yD, aDp).astype(bf16)
    wih_y_p = pad_gates(wih_y, aDp).astype(bf16)
    emb_gi = jnp.dot(emb_p, wih_y_p, preferred_element_type=jnp.float32) \
        + pad_gate_bias(p["bih"])                                     # (yD, 3*sDp) f32

    temp = p["temperature"].reshape(()).astype(jnp.float32)

    return {
        "dims": dict(sD=sD, xD=xD, aD=aD, yD=yD, sDp=sDp, xDp=xDp, aDp=aDp, yDp=yDp),
        "wx": _pad2(p["wx_t"], xDp, aDp).astype(bf16),
        # xEmbed bias + sEmbed bias both folded into the step-invariant xproj.
        "bxs": _pad2(p["bx"] + p["bs"], 1, aDp),
        "ws": _pad2(p["ws_t"], sDp, aDp).astype(bf16),
        # wEmbed row; its (1,1) bias is dropped (softmax shift-invariance).
        "ww_row": _pad2(p["ww_t"].T, 1, aDp),
        "emb_gi": emb_gi,
        "wih_x": pad_gates(wih_x, xDp).astype(bf16),
        "whh": pad_gates(p["whh_t"], sDp).astype(bf16),
        "bhh": pad_gate_bias(p["bhh"]),
        # temperature (non-trainable scalar) folded into the output projection.
        "wfc": (_pad2(p["wfc_t"], sDp, yDp) * temp).astype(bf16),
        "bfc": _pad2(p["bfc"], 1, yDp) * temp,
    }


def _pad_x(tp, x):
    d = tp["dims"]
    return jnp.pad(x, ((0, 0), (0, 0), (0, d["xDp"] - d["xD"]))).astype(jnp.bfloat16)


# ----------------------------------------------------------------------------
# Wrappers
# ----------------------------------------------------------------------------
def precompute_xproj(tp, x):
    """Step-invariant xEmbed projection; compute once per sequence and reuse."""
    x_pad = _pad_x(tp, x)
    B, T, _ = x_pad.shape
    aDp = tp["dims"]["aDp"]
    vmem = pl.BlockSpec(memory_space=pltpu.MemorySpace.VMEM)
    return pl.pallas_call(
        xproj_kernel,
        out_shape=jax.ShapeDtypeStruct((B, T, aDp), jnp.float32),
        in_specs=[vmem, vmem, vmem],
        out_specs=vmem,
    )(x_pad, tp["wx"], tp["bxs"])


def decoder_unit_forward(tp, x, sPrev, yPrev, xproj=None):
    """Equivalent of DecoderUnit.forward. Returns (output, state, alpha)."""
    d = tp["dims"]
    B, T, _ = x.shape
    x_pad = _pad_x(tp, x)
    if xproj is None:
        xproj = precompute_xproj(tp, x)
    s_pad = jnp.pad(sPrev[0], ((0, 0), (0, d["sDp"] - d["sD"])))      # (B, sDp) f32
    # Token path: gather of the fused (embedding @ W_ih_y + b_ih) table.
    # TODO(synk): this tiny (B, 3*sDp) gather stays as JAX glue outside the kernel.
    giy = tp["emb_gi"][yPrev.astype(jnp.int32)]                       # (B, 3*sDp) f32

    vmem = pl.BlockSpec(memory_space=pltpu.MemorySpace.VMEM)
    out_p, state_p, alpha = pl.pallas_call(
        decoder_step_kernel,
        out_shape=(
            jax.ShapeDtypeStruct((B, d["yDp"]), jnp.float32),
            jax.ShapeDtypeStruct((B, d["sDp"]), jnp.float32),
            jax.ShapeDtypeStruct((B, T), jnp.float32),
        ),
        in_specs=[vmem] * 11,
        out_specs=(vmem, vmem, vmem),
    )(
        xproj, x_pad, s_pad, giy,
        tp["ws"], tp["ww_row"],
        tp["wih_x"], tp["whh"], tp["bhh"],
        tp["wfc"], tp["bfc"],
    )
    return out_p[:, :d["yD"]], state_p[None, :, :d["sD"]], alpha


# ----------------------------------------------------------------------------
# Pure-JAX reference on the logical (unpadded) params, mirroring the kernel's
# precision policy (bf16 MXU operands, f32 accumulation / elementwise).
# ----------------------------------------------------------------------------
def decoder_unit_reference(params, x, sPrev, yPrev):
    f32 = jnp.float32
    bf = lambda a: a.astype(jnp.bfloat16)
    B, T, xD = x.shape
    sD, aD = params["ws_t"].shape
    s = sPrev[0]

    xProj = jnp.dot(bf(x).reshape(B * T, xD), bf(params["wx_t"]),
                    preferred_element_type=f32) + params["bx"]
    sProj = jnp.dot(bf(s), bf(params["ws_t"]), preferred_element_type=f32) + params["bs"]
    sumTanh = jnp.tanh(xProj.reshape(B, T, aD) + sProj[:, None, :])
    v = jnp.sum(sumTanh * params["ww_t"][:, 0][None, None, :], axis=-1) + params["bw"][0, 0]
    alpha = jax.nn.softmax(v, axis=1)
    context = jnp.einsum("bt,btd->bd", bf(alpha), bf(x), preferred_element_type=f32)

    yemb = bf(params["tgt_embedding"])[yPrev.astype(jnp.int32)]
    wih_y, wih_x = params["wih_t"][:aD], params["wih_t"][aD:]
    gi = (jnp.dot(yemb, bf(wih_y), preferred_element_type=f32)
          + jnp.dot(bf(context), bf(wih_x), preferred_element_type=f32) + params["bih"])
    gh = jnp.dot(bf(s), bf(params["whh_t"]), preferred_element_type=f32) + params["bhh"]
    i_r, i_z, i_n = gi[:, :sD], gi[:, sD:2 * sD], gi[:, 2 * sD:]
    h_r, h_z, h_n = gh[:, :sD], gh[:, sD:2 * sD], gh[:, 2 * sD:]
    r = jax.nn.sigmoid(i_r + h_r)
    z = jax.nn.sigmoid(i_z + h_z)
    n = jnp.tanh(i_n + r * h_n)
    h_new = (1.0 - z) * n + z * s
    out = (jnp.dot(bf(h_new), bf(params["wfc_t"]), preferred_element_type=f32)
           + params["bfc"]) * params["temperature"][0, 0]
    return out, h_new[None], alpha


# ----------------------------------------------------------------------------
# Deterministic parameter construction (shapes follow DecoderUnit.__init__)
# ----------------------------------------------------------------------------
def make_params(key, sDim, xDim, yDim, attDim):
    ks = jax.random.split(key, 8)
    nrm = lambda k, shape, std: (std * jax.random.normal(k, shape)).astype(jnp.float32)
    emdDim = attDim
    return {
        # AttentionUnit (init_weights: normal std=0.01, zero bias)
        "ws_t": nrm(ks[0], (sDim, attDim), 0.01),          # sEmbed.weight^T
        "bs":   jnp.zeros((1, attDim), jnp.float32),
        "wx_t": nrm(ks[1], (xDim, attDim), 0.01),          # xEmbed.weight^T
        "bx":   jnp.zeros((1, attDim), jnp.float32),
        "ww_t": nrm(ks[2], (attDim, 1), 0.01),             # wEmbed.weight^T
        "bw":   jnp.zeros((1, 1), jnp.float32),            # kept for fidelity (unused by kernel)
        # Embedding (yDim, emdDim), normal std=0.01
        "tgt_embedding": nrm(ks[3], (yDim, emdDim), 0.01),
        # GRU(input_size=xDim+emdDim, hidden_size=sDim), gate order (r, z, n),
        # input cat order [yemb, context]
        "wih_t": nrm(ks[4], (xDim + emdDim, 3 * sDim), 0.1),
        "whh_t": nrm(ks[5], (sDim, 3 * sDim), 0.1),
        "bih":   jnp.zeros((1, 3 * sDim), jnp.float32),
        "bhh":   jnp.zeros((1, 3 * sDim), jnp.float32),
        # fc (normal std=0.01, zero bias)
        "wfc_t": nrm(ks[6], (sDim, yDim), 0.01),
        "bfc":   jnp.zeros((1, yDim), jnp.float32),
        # temperature = ones(1), non-trainable
        "temperature": jnp.ones((1, 1), jnp.float32),
    }


if __name__ == "__main__":
    B, T = 2, 8
    sDim, xDim, yDim, attDim = 32, 32, 16, 32

    key = jax.random.PRNGKey(0)
    k_p, k_x, k_s, k_y = jax.random.split(key, 4)

    params = make_params(k_p, sDim, xDim, yDim, attDim)
    tp = prepare_tpu_params(params)                                  # one-time weight prep

    x = jax.random.normal(k_x, (B, T, xDim), jnp.float32)            # encoder features
    sPrev = jax.random.normal(k_s, (1, B, sDim), jnp.float32)        # GRU hidden (1, B, sDim)
    yPrev = jax.random.randint(k_y, (B,), 0, yDim, jnp.int32)        # previous tokens

    # Hoisted, step-invariant encoder projection (reused across decode steps).
    xproj = precompute_xproj(tp, x)

    out, state, alpha = decoder_unit_forward(tp, x, sPrev, yPrev, xproj=xproj)
    jax.block_until_ready((out, state, alpha))

    # Validate against the pure-JAX reference (same bf16/f32 precision policy).
    out_r, state_r, alpha_r = decoder_unit_reference(params, x, sPrev, yPrev)
    assert out.shape == (B, yDim) and state.shape == (1, B, sDim) and alpha.shape == (B, T)
    np.testing.assert_allclose(np.asarray(out), np.asarray(out_r), rtol=2e-3, atol=2e-3)
    np.testing.assert_allclose(np.asarray(state), np.asarray(state_r), rtol=2e-3, atol=2e-3)
    np.testing.assert_allclose(np.asarray(alpha), np.asarray(alpha_r), rtol=2e-3, atol=2e-3)

    print("KERNEL_OK")
</pallas_src>

<mosaic_0001>
module attributes {stable_mosaic.version = 11 : i64} {
  func.func @xproj_kernel(%arg0: memref<2x8x128xbf16, #tpu.memory_space<vmem>>, %arg1: memref<128x128xbf16, #tpu.memory_space<vmem>>, %arg2: memref<1x128xf32, #tpu.memory_space<vmem>>, %arg3: memref<2x8x128xf32, #tpu.memory_space<vmem>>) attributes {dimension_semantics = [], scalar_prefetch = 0 : i64, scratch_operands = 0 : i64, tpu.core_type = #tpu.core_type<tc>} {
    %c0 = arith.constant 0 : index
    %c0_0 = arith.constant 0 : index
    %c0_1 = arith.constant 0 : index
    %0 = vector.load %arg0[%c0, %c0_0, %c0_1] : memref<2x8x128xbf16, #tpu.memory_space<vmem>>, vector<2x8x128xbf16>
    %1 = vector.shape_cast %0 : vector<2x8x128xbf16> to vector<16x128xbf16>
    %c0_2 = arith.constant 0 : index
    %c0_3 = arith.constant 0 : index
    %2 = vector.load %arg1[%c0_2, %c0_3] : memref<128x128xbf16, #tpu.memory_space<vmem>>, vector<128x128xbf16>
    %cst = arith.constant dense<0.000000e+00> : vector<16x128xf32>
    %3 = tpu.matmul %1, %2, %cst {dimension_numbers = #tpu.dot_dimension_numbers<[1], [0], [0], [1], [0, 0, 1, 1], [], []>} : vector<16x128xbf16>, vector<128x128xbf16>, vector<16x128xf32> -> vector<16x128xf32>
    %c0_4 = arith.constant 0 : index
    %c0_5 = arith.constant 0 : index
    %4 = vector.load %arg2[%c0_4, %c0_5] : memref<1x128xf32, #tpu.memory_space<vmem>>, vector<1x128xf32>
    %5 = vector.broadcast %4 : vector<1x128xf32> to vector<16x128xf32>
    %6 = arith.addf %3, %5 : vector<16x128xf32>
    %7 = vector.shape_cast %6 : vector<16x128xf32> to vector<2x8x128xf32>
    %c0_6 = arith.constant 0 : index
    %c0_7 = arith.constant 0 : index
    %c0_8 = arith.constant 0 : index
    %8 = vector.load %arg3[%c0_6, %c0_7, %c0_8] : memref<2x8x128xf32, #tpu.memory_space<vmem>>, vector<2x8x128xf32>
    tpu.vector_store %arg3[%c0_6, %c0_7, %c0_8], %7 {strides = array<i32>} : memref<2x8x128xf32, #tpu.memory_space<vmem>>, vector<2x8x128xf32>,
    return
  }
}

</mosaic_0001>

<bundles_post_ra>
// kernel: tpu_custom_call.1
= control target key start
LH: loop header
LB: loop body
LE: loop exit
PB: predicated region body
PF: predicated region fallthrough
CT: control target
= control target key end

     0   :  { %8 = vsyncpa [#allocation3], 0  ;;  %s348_s0 = inlined_call_operand.hbm [shape: bf16[2,8,128], index: 0, kind: input, shape index: {}]   ;;  %s349_s1 = inlined_call_operand.hbm [shape: bf16[128,128], index: 1, kind: input, shape index: {}]   ;;  %s350_s2 = inlined_call_operand.vmem [shape: f32[1,128], index: 2, kind: input, shape index: {}]   ;;  %s351_s3 = inlined_call_operand.hbm [shape: f32[2,8,128], index: 3, kind: output, shape index: {}]  }
   0x1   :  { %9 = vsyncpa [#allocation6], 0 }
   0x2   :  { %10 = vsyncpa [#allocation4], 0  ;;  %s307_s12 = smov [#allocation2]  }
   0x3   :  { %s16_s13 = sshll.u32 %s307_s12, 4  ;;  %s17_s13 = int_to_ptr.vmem [resolvable:$true] %s16_s13 }
   0x4   :  { %s249_s14 = scalar_lea.vmem %s17_s13, 128  ;;  %p254_p1 = scmp.lt.s32.totalorder %s17_s13, %s17_s13 }
   0x5   :  { %p250_p0 = scmp.ne.s32.totalorder %s17_s13, %s249_s14  ;;  %p255_p2 = scmp.lt.s32.totalorder %s249_s14, %s249_s14 }
   0x7   :  { %p256_p3 = por %p255_p2, %p254_p1 }
   0x9   :  { %p257_p4 = pnand %p256_p3, %p250_p0 }
   0xb   :  { %260 = shalt.err (!%p257_p4)
}
   0xc   :  { %s308_s15 = smov 64   ;;  %s309_s16 = smov 4  }
   0xd   :  { %22 = dma.hbm_to_vmem [thread:$0]  %s348_s0, 128, %s17_s13, [#allocation3], %s308_s15, %s308_s15, %s309_s16  }
   0xe   :  { %s310_s19 = smov [#allocation5]  }
   0xf   :  { %s28_s20 = sshll.u32 %s310_s19, 4  ;;  %s29_s20 = int_to_ptr.vmem [resolvable:$true] %s28_s20 }
  0x10   :  { %s269_s21 = scalar_lea.vmem %s29_s20, 1024  ;;  %p274_p6 = scmp.lt.s32.totalorder %s29_s20, %s29_s20 }
  0x11   :  { %p270_p5 = scmp.ne.s32.totalorder %s29_s20, %s269_s21  ;;  %p275_p7 = scmp.lt.s32.totalorder %s269_s21, %s269_s21 }
  0x13   :  { %p276_p8 = por %p275_p7, %p274_p6 }
  0x15   :  { %p277_p9 = pnand %p276_p8, %p270_p5 }
  0x17   :  { %280 = shalt.err (!%p277_p9)
}
  0x18   :  { %34 = dma.hbm_to_vmem [thread:$0]  %s349_s1, 1024, %s29_s20, [#allocation6], %s308_s15, %s308_s15, %s309_s16  }
  0x19   :  { %301 = dma.done.wait [#allocation3], 128  }
  0x1a   :  { %302 = vsyncadd [#allocation3], 4294967168 }
  0x1b   :  { %303 = dma.done.wait [#allocation6], 1024  }
  0x1c   :  { %304 = vsyncadd [#allocation6], 4294966272  ;;  %v311_v0 = vmov 0.0   ;;  %vm312_vm0 = vmmov 0   ;;  %v232_v1 = vld [vmem:[#allocation5 + $0x38] sm:$0xff]   ;;  %v233_v2 = vld [vmem:[#allocation5 + $0x30] sm:$0xff]  }
  0x1d   :  { %203 = vmatprep.subr.bf16.mxu0 %v311_v0  ;;  %219 = vmatprep.mubr.msk.bf16.mxu0 %vm312_vm0, %v311_v0  ;;  %v234_v3 = vld [vmem:[#allocation5 + $0x28] sm:$0xff]   ;;  %v235_v4 = vld [vmem:[#allocation5 + $0x20] sm:$0xff]   ;;  %v236_v5 = vld [vmem:[#allocation5 + $0x18] sm:$0xff]   ;;  %s313_s24 = smov [#allocation7]  }
  0x1e   :  { %204 = vmatpush3.bf16.msra.mxu0 %v232_v1  ;;  %v237_v6 = vld [vmem:[#allocation5 + $0x10] sm:$0xff]   ;;  %v238_v7 = vld [vmem:[#allocation5 + $0x8] sm:$0xff]   ;;  %v239_v8 = vld [vmem:[#allocation5] sm:$0xff]   ;;  %s171_s25 = sshll.u32 %s313_s24, 4  ;;  %s172_s25 = int_to_ptr.vmem [resolvable:$true] %s171_s25 }
  0x1f   :  { %205 = vmatprep.subr.bf16.mxu0 %v311_v0  ;;  %v240_v9 = vld [vmem:[#allocation2] sm:$0xff]   ;;  %s281_s26 = scalar_lea.vmem %s172_s25, 256  ;;  %p286_p11 = scmp.lt.s32.totalorder %s172_s25, %s172_s25 }
  0x20   :  { %v184_v10 = vld [vmem:[%s350_s2] ss:$0 sm:$0xff]  ;;  %p282_p10 = scmp.ne.s32.totalorder %s172_s25, %s281_s26  ;;  %p287_p12 = scmp.lt.s32.totalorder %s281_s26, %s281_s26 }
  0x22   :  { %206 = vmatpush3.bf16.msra.mxu0 %v233_v2  ;;  %p288_p13 = por %p287_p12, %p286_p11 }
  0x23   :  { %207 = vmatprep.subr.bf16.mxu0 %v311_v0 }
  0x24   :  { %p289_p0 = pnand %p288_p13, %p282_p10 }
  0x26   :  { %208 = vmatpush3.bf16.msra.mxu0 %v234_v3 }
  0x27   :  { %209 = vmatprep.subr.bf16.mxu0 %v311_v0 }
  0x2a   :  { %210 = vmatpush3.bf16.msra.mxu0 %v235_v4 }
  0x2b   :  { %211 = vmatprep.subr.bf16.mxu0 %v311_v0 }
  0x2e   :  { %212 = vmatpush3.bf16.msra.mxu0 %v236_v5 }
  0x2f   :  { %213 = vmatprep.subr.bf16.mxu0 %v311_v0 }
  0x32   :  { %214 = vmatpush3.bf16.msra.mxu0 %v237_v6 }
  0x33   :  { %215 = vmatprep.subr.bf16.mxu0 %v311_v0 }
  0x36   :  { %216 = vmatpush3.bf16.msra.mxu0 %v238_v7 }
  0x37   :  { %217 = vmatprep.subr.bf16.mxu0 %v311_v0 }
  0x3a   :  { %218 = vmatpush3.bf16.msra.mxu0 %v239_v8 }
  0x3d   :  { %220 = vmatmul.mubr.bf16.vlgmr.msra.gmra.mxu0 %v240_v9 }
  0xfd   :  { %v157_v11 = vpop.f32.mrf.mxu0 }
  0xfe   :  { %v158_v12 = vadd.f32 %v184_v10, %v157_v11 }
  0xff   :  { %v221_v13 = vpop.f32.mrf.mxu0 }
 0x100   :  { %164 = vst [vmem:[#allocation7] sm:$0xff] %v158_v12 }
 0x101   :  { %v160_v14 = vpop.f32.mrf.mxu0 }
 0x102   :  { %v161_v15 = vadd.f32 %v184_v10, %v160_v14 }
 0x103   :  { %v222_v16 = vpop.f32.mrf.mxu0 }
 0x104   :  { %165 = vst [vmem:[#allocation7 + $0x8] sm:$0xff] %v161_v15 }
 0x105   :  { %292 = shalt.err (!%p289_p0)
}
 0x106   :  { %s314_s27 = smov 128   ;;  %s315_s2 = smov 8  }
 0x107   :  { %177 = dma.vmem_to_hbm [thread:$0]  %s172_s25, 256, %s351_s3, [#allocation4], %s314_s27, %s314_s27, %s315_s2  }
 0x108   :  { %305 = dma.done.wait [#allocation4], 256  }
 0x109   :  { %306 = vsyncadd [#allocation4], 4294967040 }
 0x10a   :  { %181 = vsyncpa [#allocation3], 1 }
 0x10b   :  { %182 = vsyncpa [#allocation6], 1 }
 0x10c   :  { %183 = vsyncpa [#allocation4], 1 }

</bundles_post_ra>
